<compile_context>
chip_gen: v7x
topology: tpu7x:2x2x1
jax: 0.10.0
libtpu: 0.0.40
codegen_flags: <defaults>
</compile_context>

<pallas_src>
import functools
import math

import jax
import jax.numpy as jnp
from jax.experimental import pallas as pl
from jax.experimental.pallas import tpu as pltpu


# ----------------------------------------------------------------------------
# Fused Pallas kernel: entire DQN forward for one batch tile
# ----------------------------------------------------------------------------
def _dqn_fused_kernel(
    obs_ref, g_ref,
    enc_w_ref, enc_b_ref,
    f1_w1a_ref, f1_w1b_ref, f1_b1_ref,
    f1_w2_ref, f1_b2_ref,
    f3_w1a_ref, f3_w1b_ref, f3_w1c_ref, f3_b1_ref,
    f3_w2_ref, f3_b2_ref,
    q_ref,
    *, inv_sqrt_e,
):
    obs = obs_ref[...]                                    # [bt, K, D]
    g = g_ref[...]                                        # [bt, Dg]

    # ---- encoder: g_enc = relu(g @ W + b) ------------------------ [bt, E]
    g_enc = jnp.dot(g, enc_w_ref[...], preferred_element_type=jnp.float32)
    g_enc = jnp.maximum(g_enc + enc_b_ref[...], 0.0)

    # ---- f1 on [obs_i ; mean_k obs_k], concat never materialized:
    #      pair @ W1 == obs @ W1[:D, :] + mean_obs @ W1[D:, :]
    mean_obs = jnp.mean(obs, axis=1)                       # [bt, D]
    h1 = jnp.einsum("bkd,de->bke", obs, f1_w1a_ref[...],
                    preferred_element_type=jnp.float32)    # [bt, K, E//2]
    mpart = jnp.dot(mean_obs, f1_w1b_ref[...],
                    preferred_element_type=jnp.float32)    # [bt, E//2]
    h1 = jnp.maximum(h1 + mpart[:, None, :] + f1_b1_ref[...], 0.0)
    h = jnp.einsum("bke,ef->bkf", h1, f1_w2_ref[...],
                   preferred_element_type=jnp.float32)
    h = h + f1_b2_ref[...]                                 # [bt, K, E]

    # ---- attention pooling over the K entities (batched, in-VMEM) -----
    scores = jnp.sum(h * g_enc[:, None, :], axis=-1) * inv_sqrt_e   # [bt, K]
    m = jnp.max(scores, axis=-1, keepdims=True)
    ex = jnp.exp(scores - m)
    w = ex * pl.reciprocal(jnp.sum(ex, axis=-1, keepdims=True))      # [bt, K]
    pooled = jnp.sum(obs * w[:, :, None], axis=1)                    # [bt, D]

    # ---- f3 on zhat = [pooled ; g_enc ; w[:, :5]] via split matmul -----
    y = (jnp.dot(pooled, f3_w1a_ref[...], preferred_element_type=jnp.float32)
         + jnp.dot(g_enc, f3_w1b_ref[...], preferred_element_type=jnp.float32)
         + jnp.dot(w[:, :5], f3_w1c_ref[...], preferred_element_type=jnp.float32)
         + f3_b1_ref[...])
    y = jnp.maximum(y, 0.0)                                          # [bt, 512]
    q = jnp.dot(y, f3_w2_ref[...],
                preferred_element_type=jnp.float32) + f3_b2_ref[...]  # [bt, A]
    q_ref[...] = q.astype(q_ref.dtype)


# ----------------------------------------------------------------------------
# Wrapper: one pallas_call, grid over the batch, weights resident across grid
# ----------------------------------------------------------------------------
def dqn_forward(params, obs, g, *, block_b=None):
    b_dim, k_dim, d_obs = obs.shape
    d_g = g.shape[1]
    e_dim = params["enc_w"].shape[1]
    a_dim = params["f3_w2"].shape[1]
    assert k_dim >= 5, "zhat uses the top-5 attention weights; need K >= 5"

    # Pre-split the concat-matmul weights once at the XLA level (free).
    f1_w1a = params["f1_w1"][:d_obs]                 # obs part          [D, E//2]
    f1_w1b = params["f1_w1"][d_obs:]                 # mean-obs part     [D, E//2]
    f3_w1a = params["f3_w1"][:d_obs]                 # pooled part       [D, 512]
    f3_w1b = params["f3_w1"][d_obs:d_obs + e_dim]    # g_enc part        [E, 512]
    f3_w1c = params["f3_w1"][d_obs + e_dim:]         # w_top5 part       [5, 512]

    weights = [
        params["enc_w"], params["enc_b"].reshape(1, -1),
        f1_w1a, f1_w1b, params["f1_b1"].reshape(1, -1),
        params["f1_w2"], params["f1_b2"].reshape(1, -1),
        f3_w1a, f3_w1b, f3_w1c, params["f3_b1"].reshape(1, -1),
        params["f3_w2"], params["f3_b2"].reshape(1, -1),
    ]

    # Batch tiling: single step at small B; sublane-aligned tiles at large B.
    if block_b is None:
        block_b = b_dim if b_dim <= 256 else 256
    if b_dim % block_b != 0:
        block_b = b_dim
    grid = (b_dim // block_b,)

    in_specs = [
        pl.BlockSpec((block_b, k_dim, d_obs), lambda i: (i, 0, 0)),   # obs
        pl.BlockSpec((block_b, d_g), lambda i: (i, 0)),               # g
    ] + [pl.BlockSpec(w.shape, lambda i: (0, 0)) for w in weights]    # resident
    out_specs = pl.BlockSpec((block_b, a_dim), lambda i: (i, 0))

    kernel = functools.partial(_dqn_fused_kernel,
                               inv_sqrt_e=1.0 / math.sqrt(e_dim))
    return pl.pallas_call(
        kernel,
        grid=grid,
        out_shape=jax.ShapeDtypeStruct((b_dim, a_dim), jnp.float32),
        in_specs=in_specs,
        out_specs=out_specs,
        compiler_params=pltpu.CompilerParams(
            dimension_semantics=("parallel",)),
    )(obs, g, *weights)


# ----------------------------------------------------------------------------
# Pure-JAX reference (for correctness checking only)
# ----------------------------------------------------------------------------
def dqn_forward_ref(params, obs, g):
    hp = jax.lax.Precision.HIGHEST
    g_enc = jax.nn.relu(jnp.dot(g, params["enc_w"], precision=hp)
                        + params["enc_b"])
    mean_obs = jnp.mean(obs, axis=1)
    pair = jnp.concatenate(
        [obs, jnp.broadcast_to(mean_obs[:, None, :], obs.shape)], axis=-1)
    h = jax.nn.relu(jnp.einsum("bki,io->bko", pair, params["f1_w1"],
                               precision=hp) + params["f1_b1"])
    h = jnp.einsum("bki,io->bko", h, params["f1_w2"],
                   precision=hp) + params["f1_b2"]
    scores = jnp.einsum("bke,be->bk", h, g_enc,
                        precision=hp) / math.sqrt(g_enc.shape[-1])
    w = jax.nn.softmax(scores, axis=-1)
    pooled = jnp.einsum("bk,bkd->bd", w, obs, precision=hp)
    zhat = jnp.concatenate([pooled, g_enc, w[:, :5]], axis=-1)
    y = jax.nn.relu(jnp.dot(zhat, params["f3_w1"], precision=hp)
                    + params["f3_b1"])
    return jnp.dot(y, params["f3_w2"], precision=hp) + params["f3_b2"]


# ----------------------------------------------------------------------------
# Parameter setup (deterministic, synthetic)
# ----------------------------------------------------------------------------
def _init_linear(key, fan_in, fan_out):
    kw, kb = jax.random.split(key)
    lim = 1.0 / math.sqrt(fan_in)
    w = jax.random.uniform(kw, (fan_in, fan_out), jnp.float32, -lim, lim)
    b = jax.random.uniform(kb, (fan_out,), jnp.float32, -lim, lim)
    return w, b


def init_dqn_params(key, d_obs, d_g, enc_out, action_shape):
    ks = jax.random.split(key, 5)
    params = {}
    # encoder: Linear(D_g, E) + ReLU      (TODO(synk): encoder arch unspecified)
    params["enc_w"], params["enc_b"] = _init_linear(ks[0], d_g, enc_out)
    # f1: Linear(2*D_obs, E//2) -> ReLU -> Linear(E//2, E)
    params["f1_w1"], params["f1_b1"] = _init_linear(ks[1], 2 * d_obs, enc_out // 2)
    params["f1_w2"], params["f1_b2"] = _init_linear(ks[2], enc_out // 2, enc_out)
    # f3: Linear(D_obs + E + 5, 512) -> ReLU -> Linear(512, action_shape)
    f3_in = d_obs + enc_out + 5
    params["f3_w1"], params["f3_b1"] = _init_linear(ks[3], f3_in, 512)
    params["f3_w2"], params["f3_b2"] = _init_linear(ks[4], 512, action_shape)
    return params


# ----------------------------------------------------------------------------
if __name__ == "__main__":
    # Small, module-consistent shapes.
    B, K, D_OBS, D_G, ENC_OUT, ACTIONS = 4, 8, 16, 12, 32, 6
    # obs_shape = (K, D_OBS) -> obs_shape[1] = D_OBS; encoder.output_sz = ENC_OUT

    key = jax.random.PRNGKey(0)
    k_par, k_obs, k_g = jax.random.split(key, 3)

    params = init_dqn_params(k_par, D_OBS, D_G, ENC_OUT, ACTIONS)
    obs = jax.random.normal(k_obs, (B, K, D_OBS), dtype=jnp.float32)
    g = jax.random.normal(k_g, (B, D_G), dtype=jnp.float32)

    q = dqn_forward(params, obs, g)
    q = jax.block_until_ready(q)
    assert q.shape == (B, ACTIONS), q.shape
    assert jnp.all(jnp.isfinite(q))

    q_ref = jax.block_until_ready(dqn_forward_ref(params, obs, g))
    assert jnp.allclose(q, q_ref, rtol=2e-2, atol=2e-2), (
        float(jnp.max(jnp.abs(q - q_ref))))
    print("KERNEL_OK")
</pallas_src>

<mosaic_0001>
module attributes {stable_mosaic.version = 11 : i64} {
  func.func @_dqn_fused_kernel(%arg0: i32, %arg1: memref<4x8x16xf32, #tpu.memory_space<vmem>>, %arg2: memref<4x12xf32, #tpu.memory_space<vmem>>, %arg3: memref<12x32xf32, #tpu.memory_space<vmem>>, %arg4: memref<1x32xf32, #tpu.memory_space<vmem>>, %arg5: memref<16x16xf32, #tpu.memory_space<vmem>>, %arg6: memref<16x16xf32, #tpu.memory_space<vmem>>, %arg7: memref<1x16xf32, #tpu.memory_space<vmem>>, %arg8: memref<16x32xf32, #tpu.memory_space<vmem>>, %arg9: memref<1x32xf32, #tpu.memory_space<vmem>>, %arg10: memref<16x512xf32, #tpu.memory_space<vmem>>, %arg11: memref<32x512xf32, #tpu.memory_space<vmem>>, %arg12: memref<5x512xf32, #tpu.memory_space<vmem>>, %arg13: memref<1x512xf32, #tpu.memory_space<vmem>>, %arg14: memref<512x6xf32, #tpu.memory_space<vmem>>, %arg15: memref<1x6xf32, #tpu.memory_space<vmem>>, %arg16: memref<4x6xf32, #tpu.memory_space<vmem>>) attributes {dimension_semantics = [#tpu.dimension_semantics<parallel>], iteration_bounds = array<i64: 1>, scalar_prefetch = 0 : i64, scratch_operands = 0 : i64, tpu.core_type = #tpu.core_type<tc>, window_params = [{transform_indices = @transform_0, window_bounds = array<i64: 4, 8, 16>}, {transform_indices = @transform_1, window_bounds = array<i64: 4, 12>}, {pipeline_mode = #tpu.pipeline_mode<synchronous>, transform_indices = @transform_2, window_bounds = array<i64: 12, 32>}, {pipeline_mode = #tpu.pipeline_mode<synchronous>, transform_indices = @transform_3, window_bounds = array<i64: 1, 32>}, {pipeline_mode = #tpu.pipeline_mode<synchronous>, transform_indices = @transform_4, window_bounds = array<i64: 16, 16>}, {pipeline_mode = #tpu.pipeline_mode<synchronous>, transform_indices = @transform_5, window_bounds = array<i64: 16, 16>}, {pipeline_mode = #tpu.pipeline_mode<synchronous>, transform_indices = @transform_6, window_bounds = array<i64: 1, 16>}, {pipeline_mode = #tpu.pipeline_mode<synchronous>, transform_indices = @transform_7, window_bounds = array<i64: 16, 32>}, {pipeline_mode = #tpu.pipeline_mode<synchronous>, transform_indices = @transform_8, window_bounds = array<i64: 1, 32>}, {pipeline_mode = #tpu.pipeline_mode<synchronous>, transform_indices = @transform_9, window_bounds = array<i64: 16, 512>}, {pipeline_mode = #tpu.pipeline_mode<synchronous>, transform_indices = @transform_10, window_bounds = array<i64: 32, 512>}, {pipeline_mode = #tpu.pipeline_mode<synchronous>, transform_indices = @transform_11, window_bounds = array<i64: 5, 512>}, {pipeline_mode = #tpu.pipeline_mode<synchronous>, transform_indices = @transform_12, window_bounds = array<i64: 1, 512>}, {pipeline_mode = #tpu.pipeline_mode<synchronous>, transform_indices = @transform_13, window_bounds = array<i64: 512, 6>}, {pipeline_mode = #tpu.pipeline_mode<synchronous>, transform_indices = @transform_14, window_bounds = array<i64: 1, 6>}, {transform_indices = @transform_15, window_bounds = array<i64: 4, 6>}]} {
    %c0 = arith.constant 0 : index
    %c0_0 = arith.constant 0 : index
    %c0_1 = arith.constant 0 : index
    %0 = vector.load %arg1[%c0, %c0_0, %c0_1] : memref<4x8x16xf32, #tpu.memory_space<vmem>>, vector<4x8x16xf32>
    %c0_2 = arith.constant 0 : index
    %c0_3 = arith.constant 0 : index
    %1 = vector.load %arg2[%c0_2, %c0_3] : memref<4x12xf32, #tpu.memory_space<vmem>>, vector<4x12xf32>
    %c0_4 = arith.constant 0 : index
    %c0_5 = arith.constant 0 : index
    %2 = vector.load %arg3[%c0_4, %c0_5] : memref<12x32xf32, #tpu.memory_space<vmem>>, vector<12x32xf32>
    %cst = arith.constant dense<0.000000e+00> : vector<4x32xf32>
    %3 = tpu.matmul %1, %2, %cst {dimension_numbers = #tpu.dot_dimension_numbers<[1], [0], [0], [1], [0, 0, 1, 1], [], []>} : vector<4x12xf32>, vector<12x32xf32>, vector<4x32xf32> -> vector<4x32xf32>
    %c0_6 = arith.constant 0 : index
    %c0_7 = arith.constant 0 : index
    %4 = vector.load %arg4[%c0_6, %c0_7] : memref<1x32xf32, #tpu.memory_space<vmem>>, vector<1x32xf32>
    %5 = vector.broadcast %4 : vector<1x32xf32> to vector<4x32xf32>
    %6 = arith.addf %3, %5 : vector<4x32xf32>
    %cst_8 = arith.constant 0.000000e+00 : f32
    %7 = vector.broadcast %cst_8 : f32 to vector<4x32xf32>
    %8 = arith.maximumf %6, %7 : vector<4x32xf32>
    %cst_9 = arith.constant dense<0.000000e+00> : vector<4x16xf32>
    %9 = vector.multi_reduction <add>, %0, %cst_9 [1] : vector<4x8x16xf32> to vector<4x16xf32>
    %cst_10 = arith.constant 8.000000e+00 : f32
    %10 = vector.broadcast %cst_10 : f32 to vector<4x16xf32>
    %11 = arith.divf %9, %10 : vector<4x16xf32>
    %c0_11 = arith.constant 0 : index
    %c0_12 = arith.constant 0 : index
    %12 = vector.load %arg5[%c0_11, %c0_12] : memref<16x16xf32, #tpu.memory_space<vmem>>, vector<16x16xf32>
    "tpu.trace_start"() <{level = 10 : i32, message = "bkd,de->bke"}> : () -> ()
    %cst_13 = arith.constant dense<0.000000e+00> : vector<4x8x16xf32>
    %13 = tpu.matmul %0, %12, %cst_13 {dimension_numbers = #tpu.dot_dimension_numbers<[2], [0], [0, 1], [1], [0, 0, 0, 1, 1, 1], [], []>} : vector<4x8x16xf32>, vector<16x16xf32>, vector<4x8x16xf32> -> vector<4x8x16xf32>
    "tpu.trace_stop"() : () -> ()
    %c0_14 = arith.constant 0 : index
    %c0_15 = arith.constant 0 : index
    %14 = vector.load %arg6[%c0_14, %c0_15] : memref<16x16xf32, #tpu.memory_space<vmem>>, vector<16x16xf32>
    %cst_16 = arith.constant dense<0.000000e+00> : vector<4x16xf32>
    %15 = tpu.matmul %11, %14, %cst_16 {dimension_numbers = #tpu.dot_dimension_numbers<[1], [0], [0], [1], [0, 0, 1, 1], [], []>} : vector<4x16xf32>, vector<16x16xf32>, vector<4x16xf32> -> vector<4x16xf32>
    %16 = vector.shape_cast %15 : vector<4x16xf32> to vector<4x1x16xf32>
    %17 = vector.broadcast %16 : vector<4x1x16xf32> to vector<4x8x16xf32>
    %18 = arith.addf %13, %17 : vector<4x8x16xf32>
    %c0_17 = arith.constant 0 : index
    %c0_18 = arith.constant 0 : index
    %19 = vector.load %arg7[%c0_17, %c0_18] : memref<1x16xf32, #tpu.memory_space<vmem>>, vector<1x16xf32>
    %20 = vector.shape_cast %19 : vector<1x16xf32> to vector<1x1x16xf32>
    %21 = vector.broadcast %20 : vector<1x1x16xf32> to vector<4x8x16xf32>
    %22 = arith.addf %18, %21 : vector<4x8x16xf32>
    %cst_19 = arith.constant 0.000000e+00 : f32
    %23 = vector.broadcast %cst_19 : f32 to vector<4x8x16xf32>
    %24 = arith.maximumf %22, %23 : vector<4x8x16xf32>
    %c0_20 = arith.constant 0 : index
    %c0_21 = arith.constant 0 : index
    %25 = vector.load %arg8[%c0_20, %c0_21] : memref<16x32xf32, #tpu.memory_space<vmem>>, vector<16x32xf32>
    "tpu.trace_start"() <{level = 10 : i32, message = "bke,ef->bkf"}> : () -> ()
    %cst_22 = arith.constant dense<0.000000e+00> : vector<4x8x32xf32>
    %26 = tpu.matmul %24, %25, %cst_22 {dimension_numbers = #tpu.dot_dimension_numbers<[2], [0], [0, 1], [1], [0, 0, 0, 1, 1, 1], [], []>} : vector<4x8x16xf32>, vector<16x32xf32>, vector<4x8x32xf32> -> vector<4x8x32xf32>
    "tpu.trace_stop"() : () -> ()
    %c0_23 = arith.constant 0 : index
    %c0_24 = arith.constant 0 : index
    %27 = vector.load %arg9[%c0_23, %c0_24] : memref<1x32xf32, #tpu.memory_space<vmem>>, vector<1x32xf32>
    %28 = vector.shape_cast %27 : vector<1x32xf32> to vector<1x1x32xf32>
    %29 = vector.broadcast %28 : vector<1x1x32xf32> to vector<4x8x32xf32>
    %30 = arith.addf %26, %29 : vector<4x8x32xf32>
    %31 = vector.shape_cast %8 : vector<4x32xf32> to vector<4x1x32xf32>
    %32 = vector.broadcast %31 : vector<4x1x32xf32> to vector<4x8x32xf32>
    %33 = arith.mulf %30, %32 : vector<4x8x32xf32>
    %cst_25 = arith.constant dense<0.000000e+00> : vector<4x8xf32>
    %34 = vector.multi_reduction <add>, %33, %cst_25 [2] : vector<4x8x32xf32> to vector<4x8xf32>
    %cst_26 = arith.constant 0.176776692 : f32
    %35 = vector.broadcast %cst_26 : f32 to vector<4x8xf32>
    %36 = arith.mulf %34, %35 : vector<4x8xf32>
    %cst_27 = arith.constant dense<0xFF800000> : vector<4xf32>
    %37 = vector.multi_reduction <maximumf>, %36, %cst_27 [1] : vector<4x8xf32> to vector<4xf32>
    %38 = vector.shape_cast %37 : vector<4xf32> to vector<4x1xf32>
    %39 = vector.broadcast %38 : vector<4x1xf32> to vector<4x8xf32>
    %40 = arith.subf %36, %39 : vector<4x8xf32>
    %41 = math.exp %40 : vector<4x8xf32>
    %cst_28 = arith.constant dense<0.000000e+00> : vector<4xf32>
    %42 = vector.multi_reduction <add>, %41, %cst_28 [1] : vector<4x8xf32> to vector<4xf32>
    %43 = vector.shape_cast %42 : vector<4xf32> to vector<4x1xf32>
    %44 = tpu.reciprocal %43 : vector<4x1xf32> -> vector<4x1xf32>
    %45 = vector.broadcast %44 : vector<4x1xf32> to vector<4x8xf32>
    %46 = arith.mulf %41, %45 : vector<4x8xf32>
    %47 = vector.shape_cast %46 : vector<4x8xf32> to vector<4x8x1xf32>
    %48 = vector.broadcast %47 : vector<4x8x1xf32> to vector<4x8x16xf32>
    %49 = arith.mulf %0, %48 : vector<4x8x16xf32>
    %cst_29 = arith.constant dense<0.000000e+00> : vector<4x16xf32>
    %50 = vector.multi_reduction <add>, %49, %cst_29 [1] : vector<4x8x16xf32> to vector<4x16xf32>
    %c0_30 = arith.constant 0 : index
    %c0_31 = arith.constant 0 : index
    %51 = vector.load %arg10[%c0_30, %c0_31] : memref<16x512xf32, #tpu.memory_space<vmem>>, vector<16x512xf32>
    %cst_32 = arith.constant dense<0.000000e+00> : vector<4x512xf32>
    %52 = tpu.matmul %50, %51, %cst_32 {dimension_numbers = #tpu.dot_dimension_numbers<[1], [0], [0], [1], [0, 0, 1, 1], [], []>} : vector<4x16xf32>, vector<16x512xf32>, vector<4x512xf32> -> vector<4x512xf32>
    %c0_33 = arith.constant 0 : index
    %c0_34 = arith.constant 0 : index
    %53 = vector.load %arg11[%c0_33, %c0_34] : memref<32x512xf32, #tpu.memory_space<vmem>>, vector<32x512xf32>
    %cst_35 = arith.constant dense<0.000000e+00> : vector<4x512xf32>
    %54 = tpu.matmul %8, %53, %cst_35 {dimension_numbers = #tpu.dot_dimension_numbers<[1], [0], [0], [1], [0, 0, 1, 1], [], []>} : vector<4x32xf32>, vector<32x512xf32>, vector<4x512xf32> -> vector<4x512xf32>
    %55 = arith.addf %52, %54 : vector<4x512xf32>
    %56 = vector.extract_strided_slice %46 {offsets = [0, 0], sizes = [4, 5], strides = [1, 1]} : vector<4x8xf32> to vector<4x5xf32>
    %c0_36 = arith.constant 0 : index
    %c0_37 = arith.constant 0 : index
    %57 = vector.load %arg12[%c0_36, %c0_37] : memref<5x512xf32, #tpu.memory_space<vmem>>, vector<5x512xf32>
    %cst_38 = arith.constant dense<0.000000e+00> : vector<4x512xf32>
    %58 = tpu.matmul %56, %57, %cst_38 {dimension_numbers = #tpu.dot_dimension_numbers<[1], [0], [0], [1], [0, 0, 1, 1], [], []>} : vector<4x5xf32>, vector<5x512xf32>, vector<4x512xf32> -> vector<4x512xf32>
    %59 = arith.addf %55, %58 : vector<4x512xf32>
    %c0_39 = arith.constant 0 : index
    %c0_40 = arith.constant 0 : index
    %60 = vector.load %arg13[%c0_39, %c0_40] : memref<1x512xf32, #tpu.memory_space<vmem>>, vector<1x512xf32>
    %61 = vector.broadcast %60 : vector<1x512xf32> to vector<4x512xf32>
    %62 = arith.addf %59, %61 : vector<4x512xf32>
    %cst_41 = arith.constant 0.000000e+00 : f32
    %63 = vector.broadcast %cst_41 : f32 to vector<4x512xf32>
    %64 = arith.maximumf %62, %63 : vector<4x512xf32>
    %c0_42 = arith.constant 0 : index
    %c0_43 = arith.constant 0 : index
    %65 = vector.load %arg14[%c0_42, %c0_43] : memref<512x6xf32, #tpu.memory_space<vmem>>, vector<512x6xf32>
    %cst_44 = arith.constant dense<0.000000e+00> : vector<4x6xf32>
    %66 = tpu.matmul %64, %65, %cst_44 {dimension_numbers = #tpu.dot_dimension_numbers<[1], [0], [0], [1], [0, 0, 1, 1], [], []>} : vector<4x512xf32>, vector<512x6xf32>, vector<4x6xf32> -> vector<4x6xf32>
    %c0_45 = arith.constant 0 : index
    %c0_46 = arith.constant 0 : index
    %67 = vector.load %arg15[%c0_45, %c0_46] : memref<1x6xf32, #tpu.memory_space<vmem>>, vector<1x6xf32>
    %68 = vector.broadcast %67 : vector<1x6xf32> to vector<4x6xf32>
    %69 = arith.addf %66, %68 : vector<4x6xf32>
    %c0_47 = arith.constant 0 : index
    %c0_48 = arith.constant 0 : index
    %70 = vector.load %arg16[%c0_47, %c0_48] : memref<4x6xf32, #tpu.memory_space<vmem>>, vector<4x6xf32>
    tpu.vector_store %arg16[%c0_47, %c0_48], %69 {strides = array<i32>} : memref<4x6xf32, #tpu.memory_space<vmem>>, vector<4x6xf32>,
    return
  }
  func.func @transform_0(%arg0: i32) -> (i32, i32, i32) {
    %c0_i32 = arith.constant 0 : i32
    %c0_i32_0 = arith.constant 0 : i32
    %c0_i32_1 = arith.constant 0 : i32
    return %arg0, %c0_i32, %c0_i32_0 : i32, i32, i32
  }
  func.func @transform_1(%arg0: i32) -> (i32, i32) {
    %c0_i32 = arith.constant 0 : i32
    %c0_i32_0 = arith.constant 0 : i32
    return %arg0, %c0_i32 : i32, i32
  }
  func.func @transform_2(%arg0: i32) -> (i32, i32) {
    %c0_i32 = arith.constant 0 : i32
    %c0_i32_0 = arith.constant 0 : i32
    %c0_i32_1 = arith.constant 0 : i32
    return %c0_i32, %c0_i32_0 : i32, i32
  }
  func.func @transform_3(%arg0: i32) -> (i32, i32) {
    %c0_i32 = arith.constant 0 : i32
    %c0_i32_0 = arith.constant 0 : i32
    %c0_i32_1 = arith.constant 0 : i32
    return %c0_i32, %c0_i32_0 : i32, i32
  }
  func.func @transform_4(%arg0: i32) -> (i32, i32) {
    %c0_i32 = arith.constant 0 : i32
    %c0_i32_0 = arith.constant 0 : i32
    %c0_i32_1 = arith.constant 0 : i32
    return %c0_i32, %c0_i32_0 : i32, i32
  }
  func.func @transform_5(%arg0: i32) -> (i32, i32) {
    %c0_i32 = arith.constant 0 : i32
    %c0_i32_0 = arith.constant 0 : i32
    %c0_i32_1 = arith.constant 0 : i32
    return %c0_i32, %c0_i32_0 : i32, i32
  }
  func.func @transform_6(%arg0: i32) -> (i32, i32) {
    %c0_i32 = arith.constant 0 : i32
    %c0_i32_0 = arith.constant 0 : i32
    %c0_i32_1 = arith.constant 0 : i32
    return %c0_i32, %c0_i32_0 : i32, i32
  }
  func.func @transform_7(%arg0: i32) -> (i32, i32) {
    %c0_i32 = arith.constant 0 : i32
    %c0_i32_0 = arith.constant 0 : i32
    %c0_i32_1 = arith.constant 0 : i32
    return %c0_i32, %c0_i32_0 : i32, i32
  }
  func.func @transform_8(%arg0: i32) -> (i32, i32) {
    %c0_i32 = arith.constant 0 : i32
    %c0_i32_0 = arith.constant 0 : i32
    %c0_i32_1 = arith.constant 0 : i32
    return %c0_i32, %c0_i32_0 : i32, i32
  }
  func.func @transform_9(%arg0: i32) -> (i32, i32) {
    %c0_i32 = arith.constant 0 : i32
    %c0_i32_0 = arith.constant 0 : i32
    %c0_i32_1 = arith.constant 0 : i32
    return %c0_i32, %c0_i32_0 : i32, i32
  }
  func.func @transform_10(%arg0: i32) -> (i32, i32) {
    %c0_i32 = arith.constant 0 : i32
    %c0_i32_0 = arith.constant 0 : i32
    %c0_i32_1 = arith.constant 0 : i32
    return %c0_i32, %c0_i32_0 : i32, i32
  }
  func.func @transform_11(%arg0: i32) -> (i32, i32) {
    %c0_i32 = arith.constant 0 : i32
    %c0_i32_0 = arith.constant 0 : i32
    %c0_i32_1 = arith.constant 0 : i32
    return %c0_i32, %c0_i32_0 : i32, i32
  }
  func.func @transform_12(%arg0: i32) -> (i32, i32) {
    %c0_i32 = arith.constant 0 : i32
    %c0_i32_0 = arith.constant 0 : i32
    %c0_i32_1 = arith.constant 0 : i32
    return %c0_i32, %c0_i32_0 : i32, i32
  }
  func.func @transform_13(%arg0: i32) -> (i32, i32) {
    %c0_i32 = arith.constant 0 : i32
    %c0_i32_0 = arith.constant 0 : i32
    %c0_i32_1 = arith.constant 0 : i32
    return %c0_i32, %c0_i32_0 : i32, i32
  }
  func.func @transform_14(%arg0: i32) -> (i32, i32) {
    %c0_i32 = arith.constant 0 : i32
    %c0_i32_0 = arith.constant 0 : i32
    %c0_i32_1 = arith.constant 0 : i32
    return %c0_i32, %c0_i32_0 : i32, i32
  }
  func.func @transform_15(%arg0: i32) -> (i32, i32) {
    %c0_i32 = arith.constant 0 : i32
    %c0_i32_0 = arith.constant 0 : i32
    return %arg0, %c0_i32 : i32, i32
  }
}

</mosaic_0001>

<bundles_post_ra>
// kernel: tpu_custom_call.1
= control target key start
LH: loop header
LB: loop body
LE: loop exit
PB: predicated region body
PF: predicated region fallthrough
CT: control target
= control target key end

     0   :  { %vm69_vm0 = vcmask 1043456   ;;  %v1835_v2 = vmov 0.0|0.0   ;;  %vm1836_vm1 = vmmov 1   ;;  %vm1837_vm3 = vmmov 0   ;;  %s2414_s0 = inlined_call_operand.vmem [shape: f32[4,8,16], index: 0, kind: input, shape index: {}]   ;;  %s2415_s1 = inlined_call_operand.vmem [shape: f32[4,12], index: 1, kind: input, shape index: {}]   ;;  %s2416_s2 = inlined_call_operand.vmem [shape: f32[12,32], index: 2, kind: input, shape index: {}]   ;;  %s2417_s3 = inlined_call_operand.vmem [shape: f32[1,32], index: 3, kind: input, shape index: {}]   ;;  %s2418_s4 = inlined_call_operand.vmem [shape: f32[16,16], index: 4, kind: input, shape index: {}]   ;;  %s2419_s5 = inlined_call_operand.vmem [shape: f32[16,16], index: 5, kind: input, shape index: {}]   ;;  %s2420_s6 = inlined_call_operand.vmem [shape: f32[1,16], index: 6, kind: input, shape index: {}]   ;;  %s2421_s7 = inlined_call_operand.vmem [shape: f32[16,32], index: 7, kind: input, shape index: {}]   ;;  %s2422_s8 = inlined_call_operand.vmem [shape: f32[1,32], index: 8, kind: input, shape index: {}]   ;;  %s2423_s9 = inlined_call_operand.vmem [shape: f32[16,512], index: 9, kind: input, shape index: {}]   ;;  %s2424_s10 = inlined_call_operand.vmem [shape: f32[32,512], index: 10, kind: input, shape index: {}]   ;;  %s2425_s11 = inlined_call_operand.vmem [shape: f32[5,512], index: 11, kind: input, shape index: {}]   ;;  %s2426_s12 = inlined_call_operand.vmem [shape: f32[1,512], index: 12, kind: input, shape index: {}]   ;;  %s2427_s13 = inlined_call_operand.vmem [shape: f32[512,6], index: 13, kind: input, shape index: {}]   ;;  %s2428_s14 = inlined_call_operand.vmem [shape: f32[1,6], index: 14, kind: input, shape index: {}]   ;;  %s2429_s15 = inlined_call_operand.hbm [shape: f32[4,6], index: 15, kind: output, shape index: {}]  }
   0x1   :  { %v56_v0 = vld [vmem:[%s2416_s2] sm:$0xff]  ;;  %v57_v1 = vld [vmem:[%s2416_s2 + $0x8] sm:$0xf]  ;;  %1681 = vmatprep.subr.bf16.mxu0 %v1835_v2  ;;  %vm1683_vm2 = vmpackc.low %vm69_vm0, %vm1836_vm1  ;;  %1685 = vmatprep.subr.bf16.mxu1 %v1835_v2  ;;  %v1838_v7 = vmov 0.0   ;;  %vm144_vm4 = vcmask 130048   ;;  %vm65_vm5 = vcmask 97280  }
   0x2   :  { %v1682_v3 = vpack.c.bf16 %v57_v1, %v56_v0  ;;  %v180_v4 = vld [vmem:[%s2419_s5] sm:$0xff]  ;;  %v181_v5 = vld [vmem:[%s2419_s5 + $0x8] sm:$0xff]  ;;  %1651 = vmatprep.mubr.msk.f32.mxu0 %vm1837_vm3, %v1838_v7  ;;  %1658 = vmatprep.mubr.msk.f32.mxu1 %vm1837_vm3, %v1838_v7  ;;  %v1958_v14 = vld [vmem:[%s2414_s0 + $0x10] sm:$0xff] }
   0x3   :  { %v1686_v6 = vpack.c.bf16 %v181_v5, %v180_v4  ;;  %v55_v8 = vld [vmem:[%s2415_s1] sm:$0xf]  ;;  %v179_v10 = vld [vmem:[%s2418_s4 + $0x8] sm:$0xff]  ;;  %v1963_v15 = vld [vmem:[%s2414_s0 + $0x18] sm:$0xff]  ;;  %v159_v18 = vsel %vm144_vm4, %v1958_v14, 0.0 }
   0x4   :  { %v178_v9 = vld [vmem:[%s2418_s4] sm:$0xff]  ;;  %1684 = vmatpush3.bf16.msk.msra.mxu0 %vm1683_vm2, %v1682_v3  ;;  %v1953_v13 = vld [vmem:[%s2414_s0 + $0x8] sm:$0xff]  ;;  %v160_v23 = vrot.slane %v159_v18, 4  ;;  %v166_v24 = vsel %vm144_vm4, %v1963_v15, 0.0 }
   0x5   :  { %v1688_v11 = vpack.c.bf16 %v179_v10, %v178_v9  ;;  %v1948_v12 = vld [vmem:[%s2414_s0] sm:$0xff]  ;;  %1687 = vmatpush3.bf16.msra.mxu1 %v1686_v6  ;;  %v152_v17 = vsel %vm144_vm4, %v1953_v13, 0.0  ;;  %v782_v19 = vld [vmem:[%s2424_s10 + $0x8] sm:$0xff] }
   0x6   :  { %v145_v16 = vsel %vm144_vm4, %v1948_v12, 0.0  ;;  %v786_v20 = vld [vmem:[%s2424_s10 + $0x28] sm:$0xff]  ;;  %v153_v22 = vrot.slane %v152_v17, 4 }
   0x7   :  { %1689 = vmatprep.subr.bf16.mxu0 %v1688_v11  ;;  %v146_v21 = vrot.slane %v145_v16, 4 }
   0x8   :  { %20 = vsyncpa [#allocation3], 0  ;;  %1652 = vmatmul.mubr.msk.f32.vlgmr.msra.gmra.mrb[0].mxu0 %vm65_vm5, %v55_v8  ;;  %v167_v25 = vrot.slane %v166_v24, 4  ;;  %v1696_v26 = vpack.c.bf16 %v786_v20, %v782_v19  ;;  %v154_v28 = vadd.f32 %v153_v22, %v152_v17  ;;  %v161_v29 = vadd.f32 %v160_v23, %v159_v18  ;;  %v781_v54 = vld [vmem:[%s2424_s10] sm:$0xff]  ;;  %v790_v57 = vld [vmem:[%s2424_s10 + $0x48] sm:$0xff]  ;;  %s1841_s16 = smov [#allocation2]  }
   0x9   :  { %v147_v27 = vadd.f32 %v146_v21, %v145_v16  ;;  %1691 = vmatpush3.bf16.msra.mxu0 %v1688_v11  ;;  %1665 = vmatprep.mubr.msk.f32.mxu0 %vm144_vm4, %v1948_v12  ;;  %vm186_vm6 = vcmask 1041409   ;;  %vm188_vm7 = vcmask 1042434   ;;  %vm190_vm8 = vcmask 1043459   ;;  %v785_v55 = vld [vmem:[%s2424_s10 + $0x20] sm:$0xff]  ;;  %v794_v58 = vld [vmem:[%s2424_s10 + $0x68] sm:$0xff]  ;;  %v784_v2 = vld [vmem:[%s2424_s10 + $0x18] sm:$0xff] }
   0xa   :  { %v168_v30 = vadd.f32 %v167_v25, %v166_v24  ;;  %1697 = vmatprep.subr.bf16.mxu0 %v1696_v26  ;;  %v155_v32 = vrot.slane %v154_v28, 2  ;;  %v162_v33 = vrot.slane %v161_v29, 2  ;;  %v1698_v56 = vpack.c.bf16 %v785_v55, %v781_v54  ;;  %v789_v60 = vld [vmem:[%s2424_s10 + $0x40] sm:$0xff]  ;;  %v422_v0 = vld [vmem:[%s2421_s7 + $0x8] sm:$0xff]  ;;  %v788_v3 = vld [vmem:[%s2424_s10 + $0x38] sm:$0xff] }
   0xb   :  { %v148_v31 = vrot.slane %v147_v27, 2  ;;  %v1700_v59 = vpack.c.bf16 %v794_v58, %v790_v57  ;;  %v793_v61 = vld [vmem:[%s2424_s10 + $0x60] sm:$0xff]  ;;  %v1704_v4 = vpack.c.bf16 %v788_v3, %v784_v2  ;;  %v1839_v5 = vmov 1966171168  }
   0xc   :  { %v169_v34 = vrot.slane %v168_v30, 2  ;;  %1666 = vmatmul.mubr.msk.f32.vlgmr.msra.gmra.mrb[2].mxu0 %vm144_vm4, %v1953_v13  ;;  %v156_v36 = vadd.f32 %v155_v32, %v154_v28  ;;  %v163_v37 = vadd.f32 %v162_v33, %v161_v29  ;;  %v1702_v62 = vpack.c.bf16 %v793_v61, %v789_v60  ;;  %v421_v63 = vld [vmem:[%s2421_s7] sm:$0xff]  ;;  %v791_v60 = vld [vmem:[%s2424_s10 + $0x50] sm:$0xff] }
   0xd   :  { %v149_v35 = vadd.f32 %v148_v31, %v147_v27  ;;  %1668 = vmatprep.mubr.msk.f32.mxu0 %vm144_vm4, %v1958_v14  ;;  %1699 = vmatpush1.bf16.msra.mxu0 %v1698_v56  ;;  %v1692_v1 = vpack.c.bf16 %v422_v0, %v421_v63  ;;  %v266_v6 = vunpack.c.l.s4 %v1839_v5  ;;  %v268_v8 = vlaneseq  ;;  %v1534_v9 = vld [vmem:[%s2417_s3] ss:$0 sm:$0xff]  ;;  %v795_v61 = vld [vmem:[%s2424_s10 + $0x70] sm:$0xff] }
   0xe   :  { %v170_v38 = vadd.f32 %v169_v34, %v168_v30  ;;  %v157_v40 = vrot.slane %v156_v36, 1  ;;  %v164_v41 = vrot.slane %v163_v37, 1  ;;  %1701 = vmatprep.subr.bf16.mxu0 %v1700_v59  ;;  %vm576_vm9 = vcmask 261120   ;;  %v1543_v0 = vld [vmem:[%s2422_s8] ss:$0 sm:$0xff] }
   0xf   :  { %v150_v39 = vrot.slane %v149_v35, 1  ;;  %1693 = vmatprep.subr.bf16.mxu1 %v1692_v1  ;;  %v267_v10 = vunpack.c.0.s8 %v266_v6  ;;  %v2027_v11 = vshrl.u32 %v268_v8, 7  ;;  %vm619_vm10 = vcmask 60416  }
  0x10   :  { %v171_v42 = vrot.slane %v170_v38, 1  ;;  %1669 = vmatmul.mubr.msk.f32.gmra.mrb[4].mxu0 %vm144_vm4, %v1963_v15  ;;  %v158_v44 = vadd.f32 %v157_v40, %v156_v36  ;;  %v165_v45 = vadd.f32 %v164_v41, %v163_v37  ;;  %vm1118_vm11 = vcmask 1044480  }
  0x11   :  { %v151_v43 = vadd.f32 %v150_v39, %v149_v35  ;;  %863 = vmatprep.mubr.f32.mxu0 %v1838_v7  ;;  %1703 = vmatpush1.bf16.msra.mxu0 %v1702_v62  ;;  %v270_v19 = vsub.s32 %v267_v10, %v2027_v11  ;;  %v2035_v31 = vsub.s32 0, %v2027_v11  ;;  %v1710_v62 = vpack.c.bf16 %v795_v61, %v791_v60 }
  0x12   :  { %v172_v46 = vadd.f32 %v171_v42, %v170_v38  ;;  %v175_v48 = vmul.f32 0.125, %v158_v44  ;;  %v176_v49 = vmul.f32 0.125, %v165_v45  ;;  %v1542_v38 = vld [vmem:[%s2420_s6] ss:$0 sm:$0xff]  ;;  %vm1115_vm12 = vcmask 39936  }
  0x13   :  { %v174_v47 = vmul.f32 0.125, %v151_v43  ;;  %vm1518_vm13 = vcmask 44032  }
  0x14   :  { %v177_v50 = vmul.f32 0.125, %v172_v46 }
  0x15   :  { %v187_v51 = vsel %vm186_vm6, %v175_v48, %v174_v47  ;;  %v783_v47 = vld [vmem:[%s2424_s10 + $0x10] sm:$0xff] }
  0x16   :  { %v189_v52 = vsel %vm188_vm7, %v176_v49, %v187_v51  ;;  %v787_v48 = vld [vmem:[%s2424_s10 + $0x30] sm:$0xff]  ;;  %v792_v49 = vld [vmem:[%s2424_s10 + $0x58] sm:$0xff] }
  0x17   :  { %v191_v53 = vsel %vm190_vm8, %v177_v50, %v189_v52  ;;  %v796_v50 = vld [vmem:[%s2424_s10 + $0x78] sm:$0xff]  ;;  %v1706_v55 = vpack.c.bf16 %v787_v48, %v783_v47  ;;  %v1840_v48 = vmov 0  }
  0x18   :  { %1659 = vmatmul.mubr.msk.f32.vlgmr.msra.gmra.mrb[0].mxu1 %vm144_vm4, %v191_v53  ;;  %v1708_v59 = vpack.c.bf16 %v796_v50, %v792_v49  ;;  %1800 = vset.pattern.permute.xlu0 %v1840_v48  ;;  %v2096_v49 = vsub.s32 1, %v2027_v11  ;;  %v2099_v50 = vsub.s32 2, %v2027_v11 }
  0x19   :  { %1695 = vmatpush3.bf16.msra.mxu1 %v1692_v1  ;;  %1799 = vset.pattern.permute.xlu1 %v1840_v48 }
  0x1a   :  { %1705 = vmatprep.subr.bf16.mxu1 %v1704_v4 }
  0xdb   :  { %v139_v16 = vpop.f32.mrb[0].mxu0 }
  0xdc   :  { %v140_v17 = vadd.f32 %v1534_v9, %v139_v16  ;;  %v1653_v18 = vpop.f32.mrb[1].mxu0 }
  0xde   :  { %v143_v20 = vmax.f32 %v140_v17, 0.0 }
  0xdf   :  { %v1667_v21 = vpop.f32.mrb[2].mxu0 }
  0xe0   :  { %v534_v22 = vrot.slane %v143_v20, %v270_v19  ;;  %v387_v23 = vpop.f32.mrb[3].mxu0  ;;  %1548 = vmatmul.mubr.msk.f32.vlgmr.msra.gmra.mrb[6].mxu0 %vm576_vm9, %v143_v20 }
  0xe1   :  { %1014 = vmatprep.mubr.f32.mxu0 %v1838_v7 }
  0xe2   :  { %v535_v24 = vcombine.high %v534_v22, %v534_v22  ;;  %v2032_v25 = vrot.slane %v534_v22, %v270_v19 }
  0xe3   :  { %v1670_v26 = vpop.f32.mrb[4].mxu0 }
  0xe4   :  { %v397_v27 = vpop.f32.mrb[5].mxu0  ;;  %v549_v28 = vrot.slane %v535_v24, %v270_v19  ;;  %v555_v9 = vrot.slane %v2032_v25, %v2035_v31  ;;  %v550_v10 = vcombine.high %v2032_v25, %v2032_v25 }
  0xe6   :  { %v559_v4 = vrot.slane %v549_v28, %v2035_v31  ;;  %v551_v5 = vcombine.high %v549_v28, %v549_v28  ;;  %v563_v24 = vrot.slane %v550_v10, %v2035_v31 }
  0xeb   :  { %v260_v29 = vpop.f32.mrb[0].mxu1 }
  0xec   :  { %v271_v30 = vrot.slane %v260_v29, %v270_v19  ;;  %v1660_v32 = vpop.f32.mrb[1].mxu1 }
  0xee   :  { %v272_v33 = vcombine.high %v271_v30, %v271_v30  ;;  %v279_v34 = vrot.slane %v271_v30, %v270_v19  ;;  %v598_v30 = vand.u32 127, %v268_v8 }
  0xf0   :  { %v286_v35 = vrot.slane %v272_v33, %v270_v19  ;;  %v292_v36 = vrot.slane %v279_v34, %v2035_v31  ;;  %v287_v37 = vcombine.high %v279_v34, %v279_v34  ;;  %v2085_v33 = vsub.s32 %v598_v30, %v2027_v11 }
  0xf2   :  { %v296_v39 = vrot.slane %v286_v35, %v2035_v31  ;;  %v388_v40 = vadd.f32 %v387_v23, %v292_v36  ;;  %v288_v41 = vcombine.high %v286_v35, %v286_v35  ;;  %v300_v42 = vrot.slane %v287_v37, %v2035_v31 }
  0xf4   :  { %v393_v43 = vadd.f32 %v1667_v21, %v296_v39  ;;  %v413_v44 = vadd.f32 %v1542_v38, %v388_v40  ;;  %v304_v45 = vrot.slane %v288_v41, %v2035_v31  ;;  %v398_v46 = vadd.f32 %v397_v27, %v300_v42 }
  0xf5   :  { %v567_v21 = vrot.slane %v551_v5, %v2035_v31 }
  0xf6   :  { %v414_v51 = vadd.f32 %v1542_v38, %v393_v43  ;;  %v417_v52 = vmax.f32 %v413_v44, 0.0  ;;  %v403_v53 = vadd.f32 %v1670_v26, %v304_v45  ;;  %v415_v54 = vadd.f32 %v1542_v38, %v398_v46 }
  0xf8   :  { %v418_v56 = vmax.f32 %v414_v51, 0.0  ;;  %v416_v57 = vadd.f32 %v1542_v38, %v403_v53  ;;  %v419_v58 = vmax.f32 %v415_v54, 0.0  ;;  %1675 = vmatprep.mubr.msk.f32.mxu1 %vm144_vm4, %v417_v52  ;;  %v2102_v51 = vsub.s32 3, %v2027_v11 }
  0xfa   :  { %1676 = vmatmul.mubr.msk.f32.vlgmr.msra.gmra.mrb[2].mxu1 %vm144_vm4, %v418_v56  ;;  %v420_v63 = vmax.f32 %v416_v57, 0.0 }
  0xfb   :  { %1678 = vmatprep.mubr.msk.f32.mxu1 %vm144_vm4, %v419_v58  ;;  %1707 = vmatpush1.bf16.msra.mxu1 %v1706_v55 }
  0xfc   :  { %1709 = vmatprep.subr.bf16.mxu1 %v1708_v59 }
  0xfe   :  { %1679 = vmatmul.mubr.msk.f32.gmra.mrb[4].mxu1 %vm144_vm4, %v420_v63 }
  0xff   :  { %1711 = vmatpush1.bf16.msra.mxu1 %v1710_v62  ;;  %934 = vmatprep.mubr.f32.mxu1 %v1838_v7 }
 0x102   :  { %1549 = vmatmul.mubr.msk.f32.vlgmr.msra.gmra.mrb[6].mxu1 %vm576_vm9, %v143_v20 }
 0x103   :  { %1085 = vmatprep.mubr.f32.mxu1 %v1838_v7 }
 0x1cd   :  { %v1677_v1 = vpop.f32.mrb[2].mxu1 }
 0x1ce   :  { %v514_v2 = vadd.f32 %v1677_v1, %v1543_v0  ;;  %v508_v3 = vpop.f32.mrb[3].mxu1 }
 0x1cf   :  { %v509_v6 = vadd.f32 %v1543_v0, %v508_v3 }
 0x1d0   :  { %v573_v16 = vmul.f32 %v559_v4, %v514_v2 }
 0x1d1   :  { %v1680_v17 = vpop.f32.mrb[4].mxu1  ;;  %v572_v18 = vmul.f32 %v555_v9, %v509_v6 }
 0x1d2   :  { %v524_v19 = vadd.f32 %v1680_v17, %v1543_v0  ;;  %v518_v20 = vpop.f32.mrb[5].mxu1  ;;  %v580_v29 = vsel %vm576_vm9, %v573_v16, 0.0 }
 0x1d3   :  { %v519_v22 = vadd.f32 %v1543_v0, %v518_v20  ;;  %v577_v23 = vsel %vm576_vm9, %v572_v18, 0.0 }
 0x1d4   :  { %578 = vadd.xlane.f32.xlu0 %v577_v23  ;;  %v575_v26 = vmul.f32 %v567_v21, %v524_v19 }
 0x1d5   :  { %v574_v27 = vmul.f32 %v563_v24, %v519_v22 }
 0x1d6   :  { %v586_v25 = vsel %vm576_vm9, %v575_v26, 0.0 }
 0x1d7   :  { %v583_v28 = vsel %vm576_vm9, %v574_v27, 0.0 }
 0x1d8   :  { %584 = vadd.xlane.f32.xlu1 %v583_v28  ;;  %581 = vadd.xlane.f32.xlu0 %v580_v29 }
 0x1dc   :  { %587 = vadd.xlane.f32.xlu1 %v586_v25 }
 0x261   :  { %v579_v32 = vpop.xlane.xlu0 %578 }
 0x262   :  { %v589_v34 = vmul.f32 0.17677669, %v579_v32 }
 0x264   :  { %v602_v39 = vrot.slane %v589_v34, %v2085_v33 }
 0x265   :  { %v585_v35 = vpop.xlane.xlu1 %584  ;;  %v582_v36 = vpop.xlane.xlu0 %581 }
 0x266   :  { %v591_v37 = vmul.f32 0.17677669, %v585_v35  ;;  %v590_v38 = vmul.f32 0.17677669, %v582_v36  ;;  %v774_v35 = vld [vmem:[%s2423_s9 + $0x8] sm:$0xff] }
 0x267   :  { %v778_v36 = vld [vmem:[%s2423_s9 + $0x28] sm:$0xff] }
 0x268   :  { %v606_v40 = vrot.slane %v590_v38, %v2085_v33  ;;  %v610_v41 = vrot.slane %v591_v37, %v2085_v33 }
 0x269   :  { %v588_v42 = vpop.xlane.xlu1 %587 }
 0x26a   :  { %v592_v43 = vmul.f32 0.17677669, %v588_v42  ;;  %v615_v44 = vsel %vm186_vm6, %v606_v40, %v602_v39  ;;  %v773_v39 = vld [vmem:[%s2423_s9] sm:$0xff] }
 0x26b   :  { %v616_v45 = vsel %vm188_vm7, %v610_v41, %v615_v44  ;;  %v777_v40 = vld [vmem:[%s2423_s9 + $0x20] sm:$0xff]  ;;  %v780_v41 = vld [vmem:[%s2423_s9 + $0x38] sm:$0xff]  ;;  %v775_v44 = vld [vmem:[%s2423_s9 + $0x10] sm:$0xff] }
 0x26c   :  { %v614_v8 = vrot.slane %v592_v43, %v2085_v33  ;;  %v1714_v42 = vpack.c.bf16 %v777_v40, %v773_v39  ;;  %v1307_v39 = vld [vmem:[%s2427_s13] sm:$0xff]  ;;  %v1308_v40 = vld [vmem:[%s2427_s13 + $0x8] sm:$0xff] }
 0x26e   :  { %v617_v46 = vsel %vm190_vm8, %v614_v8, %v616_v45  ;;  %v779_v8 = vld [vmem:[%s2423_s9 + $0x30] sm:$0xff]  ;;  %v1093_v45 = vld [vmem:[%s2425_s11 + $0x8] sm:$0x1f] }
 0x26f   :  { %v620_v47 = vsel %vm619_vm10, %v617_v46, -inf  ;;  %v1718_v46 = vpack.c.bf16 %v779_v8, %v775_v44  ;;  %v1325_v44 = vld [vmem:[%s2427_s13 + $0x90] sm:$0xff] }
 0x270   :  { %621 = vmax.xlane.f32.xlu0 %v620_v47  ;;  %v1095_v47 = vld [vmem:[%s2425_s11 + $0x18] sm:$0x1f] }
 0x2fd   :  { %v622_v52 = vpop.xlane.xlu0 %621 }
 0x2fe   :  { %v627_v53 = vrot.slane %v622_v52, %v2035_v31  ;;  %v631_v54 = vrot.slane %v622_v52, %v2096_v49  ;;  %v635_v55 = vrot.slane %v622_v52, %v2099_v50  ;;  %v639_v56 = vrot.slane %v622_v52, %v2102_v51 }
 0x300   :  { %v644_v57 = vsub.f32 %v589_v34, %v627_v53  ;;  %v645_v58 = vsub.f32 %v590_v38, %v631_v54  ;;  %v646_v59 = vsub.f32 %v591_v37, %v635_v55  ;;  %v647_v62 = vsub.f32 %v592_v43, %v639_v56  ;;  %v776_v37 = vld [vmem:[%s2423_s9 + $0x18] sm:$0xff]  ;;  %s1526_s9 = sshll.u32 %s1841_s16, 4  ;;  %s1527_s9 = int_to_ptr.vmem [resolvable:$true] %s1526_s9 }
 0x301   :  { %v1712_v38 = vpack.c.bf16 %v778_v36, %v774_v35  ;;  %v1716_v43 = vpack.c.bf16 %v780_v41, %v776_v37  ;;  %s1811_s1 = scalar_lea.vmem %s1527_s9, 64  ;;  %p1816_p1 = scmp.lt.s32.totalorder %s1527_s9, %s1527_s9 }
 0x302   :  { %v648_v60 = vmul.f32 1.442695, %v644_v57  ;;  %v650_v61 = vmul.f32 1.442695, %v645_v58  ;;  %v652_v63 = vmul.f32 1.442695, %v646_v59  ;;  %p1812_p0 = scmp.ne.s32.totalorder %s1527_s9, %s1811_s1  ;;  %p1817_p2 = scmp.lt.s32.totalorder %s1811_s1, %s1811_s1 }
 0x303   :  { %v654_v11 = vmul.f32 1.442695, %v647_v62  ;;  %1713 = vmatprep.subr.bf16.mxu0 %v1712_v38  ;;  %1717 = vmatprep.subr.bf16.mxu1 %v1716_v43  ;;  %v1340_v43 = vld [vmem:[%s2427_s13 + $0x108] sm:$0xff] }
 0x304   :  { %1801 = vpow2.f32 %v648_v60  ;;  %1715 = vmatpush1.bf16.msra.mxu0 %v1714_v42  ;;  %1719 = vmatpush1.bf16.msra.mxu1 %v1718_v46  ;;  %v1339_v42 = vld [vmem:[%s2427_s13 + $0x100] sm:$0xff]  ;;  %v1357_v46 = vld [vmem:[%s2427_s13 + $0x190] sm:$0xff]  ;;  %p1818_p3 = por %p1817_p2, %p1816_p1 }
 0x305   :  { %1803 = vpow2.f32 %v650_v61  ;;  %1552 = vmatprep.subr.msk.mxu0 %vm1118_vm11, %v1093_v45  ;;  %1555 = vmatprep.subr.msk.mxu1 %vm1118_vm11, %v1095_v47  ;;  %v1358_v47 = vld [vmem:[%s2427_s13 + $0x198] sm:$0xff] }
 0x306   :  { %1805 = vpow2.f32 %v652_v63  ;;  %p1819_p4 = pnand %p1818_p3, %p1812_p0 }
 0x307   :  { %1807 = vpow2.f32 %v654_v11 }
 0x30e   :  { %v1802_v0 = vpop.eup %1801 }
 0x30f   :  { %v1804_v1 = vpop.eup %1803  ;;  %661 = vperm.xlu1 %1799, %v1802_v0  }
 0x310   :  { %664 = vperm.xlu0 %1800, %v1804_v1   ;;  %v1806_v2 = vpop.eup %1805 }
 0x311   :  { %v1808_v3 = vpop.eup %1807 }
 0x313   :  { %667 = vperm.xlu1 %1799, %v1806_v2  }
 0x317   :  { %670 = vperm.xlu1 %1799, %v1808_v3  }
 0x38e   :  { %v662_v4 = vpop.permute.xlu1 %661 }
 0x38f   :  { %v665_v5 = vpop.permute.xlu0 %664  ;;  %v675_v10 = vrot.slane %v662_v4, %v2085_v33 }
 0x390   :  { %v679_v9 = vrot.slane %v665_v5, %v2085_v33 }
 0x392   :  { %v668_v6 = vpop.permute.xlu1 %667  ;;  %v688_v18 = vsel %vm186_vm6, %v679_v9, %v675_v10 }
 0x393   :  { %v683_v16 = vrot.slane %v668_v6, %v2085_v33 }
 0x395   :  { %v689_v20 = vsel %vm188_vm7, %v683_v16, %v688_v18 }
 0x396   :  { %v671_v17 = vpop.permute.xlu1 %670 }
 0x397   :  { %v687_v19 = vrot.slane %v671_v17, %v2085_v33 }
 0x399   :  { %v690_v21 = vsel %vm190_vm8, %v687_v19, %v689_v20 }
 0x39a   :  { %v692_v22 = vsel %vm619_vm10, %v690_v21, 0.0 }
 0x39b   :  { %693 = vadd.xlane.f32.xlu1 %v692_v22 }
 0x428   :  { %v694_v23 = vpop.xlane.xlu1 %693 }
 0x429   :  { %1809 = vrcp.f32 %v694_v23 }
 0x433   :  { %v1810_v24 = vpop.eup %1809 }
 0x434   :  { %v700_v26 = vrot.slane %v1810_v24, %v2035_v31  ;;  %v704_v28 = vrot.slane %v1810_v24, %v2096_v49  ;;  %v708_v25 = vrot.slane %v1810_v24, %v2099_v50  ;;  %v712_v32 = vrot.slane %v1810_v24, %v2102_v51 }
 0x436   :  { %v717_v27 = vmul.f32 %v1802_v0, %v700_v26  ;;  %v718_v29 = vmul.f32 %v1804_v1, %v704_v28  ;;  %v719_v30 = vmul.f32 %v1806_v2, %v708_v25  ;;  %v720_v34 = vmul.f32 %v1808_v3, %v712_v32  ;;  %v1324_v26 = vld [vmem:[%s2427_s13 + $0x88] sm:$0xff]  ;;  %v1092_v32 = vld [vmem:[%s2425_s11] sm:$0x1f] }
 0x437   :  { %v1356_v28 = vld [vmem:[%s2427_s13 + $0x188] sm:$0xff] }
 0x438   :  { %723 = vperm.xlu0 %1800, %v717_v27   ;;  %v1355_v27 = vld [vmem:[%s2427_s13 + $0x180] sm:$0xff] }
 0x439   :  { %v1752_v37 = vpack.c.bf16 %v1356_v28, %v1355_v27  ;;  %v1364_v27 = vld [vmem:[%s2427_s13 + $0x1c8] sm:$0xff] }
 0x43c   :  { %728 = vperm.xlu0 %1800, %v718_v29  }
 0x440   :  { %733 = vperm.xlu0 %1800, %v719_v30  }
 0x444   :  { %738 = vperm.xlu0 %1800, %v720_v34   ;;  %v1094_v34 = vld [vmem:[%s2425_s11 + $0x10] sm:$0x1f] }
 0x4b7   :  { %v2152_v48 = vpop.permute.xlu0 %723 }
 0x4b8   :  { %v741_v52 = vmul.f32 %v2152_v48, %v1948_v12  ;;  %v1099_v8 = vrot.slane %v2152_v48, %v2085_v33  ;;  %v1722_v48 = vpack.c.bf16 %v1308_v40, %v1307_v39  ;;  %v1365_v39 = vld [vmem:[%s2427_s13 + $0x1d0] sm:$0xff]  ;;  %v1366_v40 = vld [vmem:[%s2427_s13 + $0x1d8] sm:$0xff] }
 0x4ba   :  { %v745_v53 = vsel %vm144_vm4, %v741_v52, 0.0 }
 0x4bb   :  { %v746_v54 = vrot.slane %v745_v53, 4  ;;  %v2157_v55 = vpop.permute.xlu0 %728 }
 0x4bc   :  { %v742_v56 = vmul.f32 %v2157_v55, %v1953_v13  ;;  %v1103_v38 = vrot.slane %v2157_v55, %v2085_v33 }
 0x4bd   :  { %v747_v58 = vadd.f32 %v746_v54, %v745_v53  ;;  %v1754_v53 = vpack.c.bf16 %v1340_v43, %v1339_v42  ;;  %v1310_v54 = vld [vmem:[%s2427_s13 + $0x18] sm:$0xff]  ;;  %v1317_v43 = vld [vmem:[%s2427_s13 + $0x50] sm:$0xff] }
 0x4be   :  { %v752_v57 = vsel %vm144_vm4, %v742_v56, 0.0  ;;  %v1112_v52 = vsel %vm186_vm6, %v1103_v38, %v1099_v8  ;;  %v1334_v38 = vld [vmem:[%s2427_s13 + $0xd8] sm:$0xff] }
 0x4bf   :  { %v753_v59 = vrot.slane %v752_v57, 4  ;;  %v2162_v60 = vpop.permute.xlu0 %733  ;;  %v748_v63 = vrot.slane %v747_v58, 2 }
 0x4c0   :  { %v743_v61 = vmul.f32 %v2162_v60, %v1958_v14  ;;  %v1107_v41 = vrot.slane %v2162_v60, %v2085_v33  ;;  %v1327_v60 = vld [vmem:[%s2427_s13 + $0xa0] sm:$0xff] }
 0x4c1   :  { %v754_v62 = vadd.f32 %v753_v59, %v752_v57  ;;  %v749_v5 = vadd.f32 %v748_v63, %v747_v58  ;;  %v1756_v57 = vpack.c.bf16 %v1358_v47, %v1357_v46  ;;  %v1341_v58 = vld [vmem:[%s2427_s13 + $0x110] sm:$0xff]  ;;  %v1342_v59 = vld [vmem:[%s2427_s13 + $0x118] sm:$0xff]  ;;  %v1360_v63 = vld [vmem:[%s2427_s13 + $0x1a8] sm:$0xff] }
 0x4c2   :  { %v759_v12 = vsel %vm144_vm4, %v743_v61, 0.0  ;;  %v1113_v55 = vsel %vm188_vm7, %v1107_v41, %v1112_v52  ;;  %v1350_v46 = vld [vmem:[%s2427_s13 + $0x158] sm:$0xff]  ;;  %v1335_v47 = vld [vmem:[%s2427_s13 + $0xe0] sm:$0xff]  ;;  %v1336_v52 = vld [vmem:[%s2427_s13 + $0xe8] sm:$0xff] }
 0x4c3   :  { %v755_v11 = vrot.slane %v754_v62, 2  ;;  %v760_v0 = vrot.slane %v759_v12, 4  ;;  %v2167_v1 = vpop.permute.xlu0 %738  ;;  %v750_v17 = vrot.slane %v749_v5, 1 }
 0x4c4   :  { %v744_v13 = vmul.f32 %v2167_v1, %v1963_v15  ;;  %v1323_v15 = vld [vmem:[%s2427_s13 + $0x80] sm:$0xff]  ;;  %v1111_v45 = vrot.slane %v2167_v1, %v2085_v33  ;;  %v1309_v33 = vld [vmem:[%s2427_s13 + $0x10] sm:$0xff] }
 0x4c5   :  { %v756_v2 = vadd.f32 %v755_v11, %v754_v62  ;;  %v761_v3 = vadd.f32 %v760_v0, %v759_v12  ;;  %v751_v23 = vadd.f32 %v750_v17, %v749_v5  ;;  %v1720_v36 = vpack.c.bf16 %v1324_v26, %v1323_v15  ;;  %v1328_v62 = vld [vmem:[%s2427_s13 + $0xa8] sm:$0xff]  ;;  %v1359_v12 = vld [vmem:[%s2427_s13 + $0x1a0] sm:$0xff] }
 0x4c6   :  { %v766_v4 = vsel %vm144_vm4, %v744_v13, 0.0  ;;  %v1114_v61 = vsel %vm190_vm8, %v1111_v45, %v1113_v55  ;;  %v1726_v11 = vpack.c.bf16 %v1310_v54, %v1309_v33  ;;  %v1758_v0 = vpack.c.bf16 %v1342_v59, %v1341_v58  ;;  %v1311_v1 = vld [vmem:[%s2427_s13 + $0x20] sm:$0xff]  ;;  %v1312_v13 = vld [vmem:[%s2427_s13 + $0x28] sm:$0xff] }
 0x4c7   :  { %v762_v6 = vrot.slane %v761_v3, 2  ;;  %v767_v9 = vrot.slane %v766_v4, 4  ;;  %v757_v10 = vrot.slane %v756_v2, 1  ;;  %v1344_v5 = vld [vmem:[%s2427_s13 + $0x128] sm:$0xff]  ;;  %v1363_v26 = vld [vmem:[%s2427_s13 + $0x1c0] sm:$0xff]  ;;  %v1772_v45 = vpack.c.bf16 %v1366_v40, %v1365_v39 }
 0x4c8   :  { %v1332_v15 = vld [vmem:[%s2427_s13 + $0xc8] sm:$0xff]  ;;  %v1744_v55 = vpack.c.bf16 %v1336_v52, %v1335_v47 }
 0x4c9   :  { %v763_v14 = vadd.f32 %v762_v6, %v761_v3  ;;  %v768_v16 = vadd.f32 %v767_v9, %v766_v4  ;;  %v758_v20 = vadd.f32 %v757_v10, %v756_v2  ;;  %v1728_v2 = vpack.c.bf16 %v1328_v62, %v1327_v60  ;;  %v1343_v4 = vld [vmem:[%s2427_s13 + $0x120] sm:$0xff]  ;;  %v1329_v6 = vld [vmem:[%s2427_s13 + $0xb0] sm:$0xff]  ;;  %v1330_v9 = vld [vmem:[%s2427_s13 + $0xb8] sm:$0xff] }
 0x4ca   :  { %v1760_v3 = vpack.c.bf16 %v1360_v63, %v1359_v12  ;;  %v1361_v10 = vld [vmem:[%s2427_s13 + $0x1b0] sm:$0xff]  ;;  %v1762_v17 = vpack.c.bf16 %v1344_v5, %v1343_v4  ;;  %v1320_v58 = vld [vmem:[%s2427_s13 + $0x68] sm:$0xff]  ;;  %v1351_v60 = vld [vmem:[%s2427_s13 + $0x160] sm:$0xff] }
 0x4cb   :  { %v764_v18 = vrot.slane %v763_v14, 1  ;;  %v769_v19 = vrot.slane %v768_v16, 2  ;;  %v945_v25 = vsel %vm186_vm6, %v758_v20, %v751_v23  ;;  %v1732_v20 = vpack.c.bf16 %v1330_v9, %v1329_v6  ;;  %v1346_v23 = vld [vmem:[%s2427_s13 + $0x138] sm:$0xff]  ;;  %v1337_v12 = vld [vmem:[%s2427_s13 + $0xf0] sm:$0xff] }
 0x4cc   :  { %v1338_v63 = vld [vmem:[%s2427_s13 + $0xf8] sm:$0xff]  ;;  %v1353_v5 = vld [vmem:[%s2427_s13 + $0x170] sm:$0xff] }
 0x4cd   :  { %v770_v21 = vadd.f32 %v769_v19, %v768_v16  ;;  %v765_v22 = vadd.f32 %v764_v18, %v763_v14  ;;  %v1362_v14 = vld [vmem:[%s2427_s13 + $0x1b8] sm:$0xff]  ;;  %v1730_v16 = vpack.c.bf16 %v1312_v13, %v1311_v1  ;;  %v1313_v18 = vld [vmem:[%s2427_s13 + $0x30] sm:$0xff] }
 0x4ce   :  { %v1314_v19 = vld [vmem:[%s2427_s13 + $0x38] sm:$0xff]  ;;  %v1321_v13 = vld [vmem:[%s2427_s13 + $0x70] sm:$0xff] }
 0x4cf   :  { %v771_v24 = vrot.slane %v770_v21, 1  ;;  %v946_v30 = vsel %vm188_vm7, %v765_v22, %v945_v25  ;;  %v1345_v22 = vld [vmem:[%s2427_s13 + $0x130] sm:$0xff]  ;;  %v1734_v28 = vpack.c.bf16 %v1314_v19, %v1313_v18  ;;  %v1315_v25 = vld [vmem:[%s2427_s13 + $0x40] sm:$0xff]  ;;  %v1370_v1 = vld [vmem:[%s2427_s13 + $0x1f8] sm:$0xff] }
 0x4d0   :  { %v1354_v6 = vld [vmem:[%s2427_s13 + $0x178] sm:$0xff] }
 0x4d1   :  { %v772_v29 = vadd.f32 %v771_v24, %v770_v21  ;;  %v1764_v21 = vpack.c.bf16 %v1362_v14, %v1361_v10  ;;  %v1331_v24 = vld [vmem:[%s2427_s13 + $0xc0] sm:$0xff]  ;;  %v1782_v9 = vpack.c.bf16 %v1354_v6, %v1353_v5 }
 0x4d2   :  { %v1277_v10 = vld [vmem:[%s2426_s12] sm:$0xf] }
 0x4d3   :  { %v947_v35 = vsel %vm190_vm8, %v772_v29, %v946_v30  ;;  %v1766_v29 = vpack.c.bf16 %v1346_v23, %v1345_v22  ;;  %v1316_v30 = vld [vmem:[%s2427_s13 + $0x48] sm:$0xff]  ;;  %v1282_v14 = vrot.slane %v1277_v10, %v2035_v31  ;;  %v1294_v18 = vrot.slane %v1277_v10, %v2102_v51 }
 0x4d4   :  { %1550 = vmatmul.mubr.msk.f32.vlgmr.msra.gmra.mrb[6].mxu0 %vm144_vm4, %v947_v35  ;;  %1551 = vmatmul.mubr.msk.f32.vlgmr.msra.gmra.mrb[6].mxu1 %vm144_vm4, %v947_v35  ;;  %v1347_v35 = vld [vmem:[%s2427_s13 + $0x140] sm:$0xff]  ;;  %v1738_v41 = vpack.c.bf16 %v1316_v30, %v1315_v25 }
 0x4d5   :  { %1553 = vmatpush1.msk.msra.mxu0 %vm1118_vm11, %v1092_v32  ;;  %1556 = vmatpush1.msk.msra.mxu1 %vm1118_vm11, %v1094_v34  ;;  %v1736_v32 = vpack.c.bf16 %v1332_v15, %v1331_v24  ;;  %v1768_v34 = vpack.c.bf16 %v1364_v27, %v1363_v26 }
 0x4d6   :  { %1195 = vmatprep.mubr.f32.mxu0 %v1838_v7  ;;  %1266 = vmatprep.mubr.f32.mxu1 %v1838_v7  ;;  %v1326_v7 = vld [vmem:[%s2427_s13 + $0x98] sm:$0xff] }
 0x4d7   :  { %1721 = vmatprep.subr.bf16.mxu0 %v1720_v36  ;;  %1753 = vmatprep.subr.bf16.mxu1 %v1752_v37  ;;  %v1724_v56 = vpack.c.bf16 %v1326_v7, %v1325_v44  ;;  %v1348_v36 = vld [vmem:[%s2427_s13 + $0x148] sm:$0xff]  ;;  %v1333_v37 = vld [vmem:[%s2427_s13 + $0xd0] sm:$0xff]  ;;  %v1318_v44 = vld [vmem:[%s2427_s13 + $0x58] sm:$0xff] }
 0x4d8   :  { %v1770_v42 = vpack.c.bf16 %v1348_v36, %v1347_v35  ;;  %v1740_v8 = vpack.c.bf16 %v1334_v38, %v1333_v37  ;;  %v1349_v7 = vld [vmem:[%s2427_s13 + $0x150] sm:$0xff]  ;;  %v1742_v33 = vpack.c.bf16 %v1318_v44, %v1317_v43 }
 0x4d9   :  { %v1774_v54 = vpack.c.bf16 %v1350_v46, %v1349_v7 }
 0x4dc   :  { %1554 = vmatmul.mubr.msk.f32.vlgmr.msra.gmra.mrb[6].mxu0 %vm1115_vm12, %v1114_v61  ;;  %1557 = vmatmul.mubr.msk.f32.vlgmr.msra.gmra.mrb[6].mxu1 %vm1115_vm12, %v1114_v61  ;;  %v1352_v61 = vld [vmem:[%s2427_s13 + $0x168] sm:$0xff] }
 0x4dd   :  { %1723 = vmatpush3.bf16.msra.mxu0 %v1722_v48  ;;  %1755 = vmatpush3.bf16.msra.mxu1 %v1754_v53  ;;  %v1367_v48 = vld [vmem:[%s2427_s13 + $0x1e0] sm:$0xff]  ;;  %v1368_v53 = vld [vmem:[%s2427_s13 + $0x1e8] sm:$0xff]  ;;  %v1778_v62 = vpack.c.bf16 %v1352_v61, %v1351_v60 }
 0x4de   :  { %1725 = vmatprep.subr.bf16.mxu0 %v1724_v56  ;;  %1757 = vmatprep.subr.bf16.mxu1 %v1756_v57  ;;  %v1776_v56 = vpack.c.bf16 %v1368_v53, %v1367_v48  ;;  %v1319_v57 = vld [vmem:[%s2427_s13 + $0x60] sm:$0xff] }
 0x4df   :  { %v1746_v59 = vpack.c.bf16 %v1320_v58, %v1319_v57 }
 0x4e1   :  { %1727 = vmatpush3.bf16.msra.mxu0 %v1726_v11  ;;  %1759 = vmatpush3.bf16.msra.mxu1 %v1758_v0  ;;  %v1369_v11 = vld [vmem:[%s2427_s13 + $0x1f0] sm:$0xff]  ;;  %v1748_v0 = vpack.c.bf16 %v1338_v63, %v1337_v12 }
 0x4e2   :  { %1729 = vmatprep.subr.bf16.mxu0 %v1728_v2  ;;  %1761 = vmatprep.subr.bf16.mxu1 %v1760_v3  ;;  %v1322_v2 = vld [vmem:[%s2427_s13 + $0x78] sm:$0xff]  ;;  %v1780_v3 = vpack.c.bf16 %v1370_v1, %v1369_v11 }
 0x4e3   :  { %v1750_v4 = vpack.c.bf16 %v1322_v2, %v1321_v13 }
 0x4e5   :  { %1731 = vmatpush3.bf16.msra.mxu0 %v1730_v16  ;;  %1763 = vmatpush3.bf16.msra.mxu1 %v1762_v17  ;;  %v1290_v16 = vrot.slane %v1277_v10, %v2099_v50  ;;  %v1286_v17 = vrot.slane %v1277_v10, %v2096_v49  ;;  %v1558_v50 = vld [vmem:[%s2428_s14] ss:$0 sm:$0xff] }
 0x4e6   :  { %1733 = vmatprep.subr.bf16.mxu0 %v1732_v20  ;;  %1765 = vmatprep.subr.bf16.mxu1 %v1764_v21 }
 0x4e9   :  { %1735 = vmatpush3.bf16.msra.mxu0 %v1734_v28  ;;  %1767 = vmatpush3.bf16.msra.mxu1 %v1766_v29 }
 0x4ea   :  { %1737 = vmatprep.subr.bf16.mxu0 %v1736_v32  ;;  %1769 = vmatprep.subr.bf16.mxu1 %v1768_v34 }
 0x4ed   :  { %1739 = vmatpush3.bf16.msra.mxu0 %v1738_v41  ;;  %1771 = vmatpush3.bf16.msra.mxu1 %v1770_v42 }
 0x4ee   :  { %1741 = vmatprep.subr.bf16.mxu0 %v1740_v8  ;;  %1773 = vmatprep.subr.bf16.mxu1 %v1772_v45 }
 0x4f1   :  { %1743 = vmatpush3.bf16.msra.mxu0 %v1742_v33  ;;  %1775 = vmatpush3.bf16.msra.mxu1 %v1774_v54 }
 0x4f2   :  { %1745 = vmatprep.subr.bf16.mxu0 %v1744_v55  ;;  %1777 = vmatprep.subr.bf16.mxu1 %v1776_v56 }
 0x4f5   :  { %1747 = vmatpush3.bf16.msra.mxu0 %v1746_v59  ;;  %1779 = vmatpush3.bf16.msra.mxu1 %v1778_v62 }
 0x4f6   :  { %1749 = vmatprep.subr.bf16.mxu0 %v1748_v0  ;;  %1781 = vmatprep.subr.bf16.mxu1 %v1780_v3 }
 0x4f9   :  { %1751 = vmatpush3.bf16.msra.mxu0 %v1750_v4  ;;  %1783 = vmatpush3.bf16.msra.mxu1 %v1782_v9 }
 0x5af   :  { %v1197_v19 = vpop.f32.mrb[6].mxu0  ;;  %v1268_v20 = vpop.f32.mrb[6].mxu1 }
 0x5b0   :  { %v1299_v21 = vadd.f32 %v1282_v14, %v1197_v19  ;;  %v1301_v22 = vadd.f32 %v1290_v16, %v1268_v20  ;;  %v1199_v23 = vpop.f32.mrb[7].mxu0  ;;  %v1270_v24 = vpop.f32.mrb[7].mxu1 }
 0x5b1   :  { %v1300_v15 = vadd.f32 %v1286_v17, %v1199_v23  ;;  %v1302_v26 = vadd.f32 %v1294_v18, %v1270_v24 }
 0x5b2   :  { %v1303_v29 = vmax.f32 %v1299_v21, 0.0  ;;  %v1305_v25 = vmax.f32 %v1301_v22, 0.0 }
 0x5b3   :  { %v1304_v27 = vmax.f32 %v1300_v15, 0.0  ;;  %v1306_v28 = vmax.f32 %v1302_v26, 0.0 }
 0x5b5   :  { %1442 = vmatprep.mubr.f32.mxu0 %v1304_v27  ;;  %1512 = vmatprep.mubr.f32.mxu1 %v1306_v28 }
 0x5b6   :  { %1443 = vmatmul.mubr.f32.vlgmr.msra.gmra.mrb[8].mxu0 %v1303_v29  ;;  %1513 = vmatmul.mubr.f32.vlgmr.msra.gmra.mrb[8].mxu1 %v1305_v25 }
 0x689   :  { %v1609_v31 = vpop.f32.mrb[8].mxu0  ;;  %v1644_v49 = vpop.f32.mrb[8].mxu1 }
 0x68a   :  { %v1610_v51 = vpop.f32.mrb[9].mxu0  ;;  %v1645_v30 = vpop.f32.mrb[9].mxu1 }
 0x68b   :  { %v1611_v32 = vadd.f32 %v1610_v51, %v1609_v31  ;;  %v1646_v34 = vadd.f32 %v1645_v30, %v1644_v49 }
 0x68d   :  { %v1445_v35 = vadd.f32 %v1611_v32, %v1558_v50 }
 0x68f   :  { %v1515_v36 = vadd.f32 %v1646_v34, %v1445_v35 }
 0x691   :  { %1519 = vst.msk [vmem:[#allocation2] sm:$0xf] %vm1518_vm13, %v1515_v36 }
 0x692   :  { %1822 = shalt.err (!%p1819_p4)
}
 0x693   :  { %s1823_s18 = scalar_lea.hbm %s2429_s15, 64 }
 0x694   :  { %p1824_p5 = scmp.ne.s32.totalorder %s2429_s15, %s1823_s18  ;;  %p1827_p6 = scmp.lt.u32.totalorder %s1823_s18, %s2429_s15 }
 0x696   :  { %p1829_p7 = pnand %p1827_p6, %p1824_p5 }
 0x698   :  { %1832 = shalt.err (!%p1829_p7)
}
 0x699   :  { %1529 = dma.vmem_to_hbm [thread:$0]  %s1527_s9, 64, %s2429_s15, [#allocation3]  }
 0x69a   :  { %1833 = dma.done.wait [#allocation3], 64  }
 0x69b   :  { %1834 = vsyncadd [#allocation3], 4294967232 }
 0x69c   :  { %1533 = vsyncpa [#allocation3], 1 }

</bundles_post_ra>
